<compile_context>
chip_gen: v7x
topology: tpu7x:2x2x1
jax: 0.10.0
libtpu: 0.0.40
codegen_flags: <defaults>
</compile_context>

<pallas_src>
import jax
import jax.numpy as jnp
from jax.experimental import pallas as pl
from jax.experimental.pallas import tpu as pltpu


def _se_gate_kernel(gate_ref, x_ref, o_ref):
    # gate_ref: (Cblk, 1), x_ref / o_ref: (Cblk, HW) -- native-dtype refs.
    # Upcast in-register; only loads/stores use the narrow wire dtype.
    g = gate_ref[...].astype(jnp.float32)
    x = x_ref[...].astype(jnp.float32)
    # Sigmoid only on the (Cblk, 1) gate column; the HW broadcast is done by
    # the single multiply below.  NOTE: the column is lane-padded to 128, so
    # the EUP still pushes Cblk/8 vregs; a lane-dense (8, Cblk/8) view would
    # save ~0.2 us but needs a lane->sublane relayout inside the kernel that
    # costs (and risks) more than it saves, so the robust form is kept.
    s = jax.nn.sigmoid(g)
    o_ref[...] = (s * x).astype(o_ref.dtype)


def sigmoid_mul(x140, x136):
    """sigmoid(x140) * x136, with x140: (N, C, 1, 1) and x136: (N, C, H, W)."""
    n, c, h, w = x136.shape
    assert x140.shape == (n, c, 1, 1), (x140.shape, x136.shape)

    hw = h * w
    rows = n * c  # fold batch into the channel axis (NCHW-contiguous reshape)
    out_dtype = jnp.promote_types(x140.dtype, x136.dtype)

    # Pure layout glue: no copies, no dtype casts on the HBM wire.
    gate2d = x140.reshape(rows, 1)
    x2d = x136.reshape(rows, hw)

    # 2-way channel split:
    #   * v7x: the two blocks land on the two TensorCores ("parallel").
    #   * v5e/v6e: one core, but step-1 input DMA overlaps step-0 compute and
    #     output writeback via the 2-deep BlockSpec pipeline.
    nblk = 2 if (rows % 16 == 0 and rows >= 16) else 1
    rblk = rows // nblk

    cost = pl.CostEstimate(
        flops=2 * rows * hw,
        transcendentals=rows,
        bytes_accessed=(2 * rows * hw + rows) * jnp.dtype(out_dtype).itemsize,
    )

    if nblk == 1:
        # Single-block fallback: no grid level at all (whole arrays in VMEM).
        out2d = pl.pallas_call(
            _se_gate_kernel,
            out_shape=jax.ShapeDtypeStruct((rows, hw), out_dtype),
            cost_estimate=cost,
        )(gate2d, x2d)
    else:
        out2d = pl.pallas_call(
            _se_gate_kernel,
            out_shape=jax.ShapeDtypeStruct((rows, hw), out_dtype),
            grid=(nblk,),
            in_specs=[
                pl.BlockSpec((rblk, 1), lambda i: (i, 0)),
                pl.BlockSpec((rblk, hw), lambda i: (i, 0)),
            ],
            out_specs=pl.BlockSpec((rblk, hw), lambda i: (i, 0)),
            compiler_params=pltpu.CompilerParams(
                dimension_semantics=("parallel",),
            ),
            cost_estimate=cost,
            # NOTE: if x136 were dead after this op, input_output_aliases={1: 0}
            # would write the result in place; left off because callers
            # (including the reference check below) may still read x136.
        )(gate2d, x2d)

    return out2d.reshape(n, c, h, w)


if __name__ == "__main__":
    key = jax.random.PRNGKey(0)
    k1, k2 = jax.random.split(key)

    # Shapes from the reference module (already small: ~0.5 MB activation).
    x136 = jax.random.normal(k1, (1, 640, 14, 14), dtype=jnp.float32)
    x140 = jax.random.normal(k2, (1, 640, 1, 1), dtype=jnp.float32)

    out = sigmoid_mul(x140, x136)
    jax.block_until_ready(out)

    # Reference check in plain JAX.
    ref = jax.nn.sigmoid(x140) * x136
    assert out.shape == ref.shape, (out.shape, ref.shape)
    assert out.dtype == ref.dtype, (out.dtype, ref.dtype)
    assert jnp.allclose(out, ref, atol=1e-5, rtol=1e-5)

    print("KERNEL_OK")
</pallas_src>

<mosaic_0001>
module attributes {stable_mosaic.version = 11 : i64} {
  func.func @_se_gate_kernel(%arg0: i32, %arg1: memref<320x1xf32, #tpu.memory_space<vmem>>, %arg2: memref<320x196xf32, #tpu.memory_space<vmem>>, %arg3: memref<320x196xf32, #tpu.memory_space<vmem>>) attributes {dimension_semantics = [#tpu.dimension_semantics<parallel>], iteration_bounds = array<i64: 2>, scalar_prefetch = 0 : i64, scratch_operands = 0 : i64, tpu.core_type = #tpu.core_type<tc>, window_params = [{transform_indices = @transform_0, window_bounds = array<i64: 320, 1>}, {transform_indices = @transform_1, window_bounds = array<i64: 320, 196>}, {transform_indices = @transform_2, window_bounds = array<i64: 320, 196>}]} {
    %c0 = arith.constant 0 : index
    %c0_0 = arith.constant 0 : index
    %0 = vector.load %arg1[%c0, %c0_0] : memref<320x1xf32, #tpu.memory_space<vmem>>, vector<320x1xf32>
    %c0_1 = arith.constant 0 : index
    %c0_2 = arith.constant 0 : index
    %1 = vector.load %arg2[%c0_1, %c0_2] : memref<320x196xf32, #tpu.memory_space<vmem>>, vector<320x196xf32>
    %2 = arith.negf %0 : vector<320x1xf32>
    %3 = math.exp %2 : vector<320x1xf32>
    %cst = arith.constant 1.000000e+00 : f32
    %4 = vector.broadcast %cst : f32 to vector<320x1xf32>
    %5 = arith.addf %4, %3 : vector<320x1xf32>
    %6 = arith.divf %4, %5 : vector<320x1xf32>
    %7 = vector.broadcast %6 : vector<320x1xf32> to vector<320x196xf32>
    %8 = arith.mulf %7, %1 : vector<320x196xf32>
    %c0_3 = arith.constant 0 : index
    %c0_4 = arith.constant 0 : index
    %9 = vector.load %arg3[%c0_3, %c0_4] : memref<320x196xf32, #tpu.memory_space<vmem>>, vector<320x196xf32>
    tpu.vector_store %arg3[%c0_3, %c0_4], %8 {strides = array<i32>} : memref<320x196xf32, #tpu.memory_space<vmem>>, vector<320x196xf32>,
    return
  }
  func.func @transform_0(%arg0: i32) -> (i32, i32) {
    %c0_i32 = arith.constant 0 : i32
    %c0_i32_0 = arith.constant 0 : i32
    return %arg0, %c0_i32 : i32, i32
  }
  func.func @transform_1(%arg0: i32) -> (i32, i32) {
    %c0_i32 = arith.constant 0 : i32
    %c0_i32_0 = arith.constant 0 : i32
    return %arg0, %c0_i32 : i32, i32
  }
  func.func @transform_2(%arg0: i32) -> (i32, i32) {
    %c0_i32 = arith.constant 0 : i32
    %c0_i32_0 = arith.constant 0 : i32
    return %arg0, %c0_i32 : i32, i32
  }
}

</mosaic_0001>

<bundles_post_ra>
// kernel: tpu_custom_call.1
= control target key start
LH: loop header
LB: loop body
LE: loop exit
PB: predicated region body
PF: predicated region fallthrough
CT: control target
= control target key end

     0   :  { %s1214_s9 = smov 0   ;;  %s1484_s0 = inlined_call_operand.vmem [shape: f32[640,1], index: 0, kind: input, shape index: {}]   ;;  %s1485_s1 = inlined_call_operand.vmem [shape: f32[640,196], index: 1, kind: input, shape index: {}]   ;;  %s1486_s2 = inlined_call_operand.vmem [shape: f32[640,196], index: 2, kind: output, shape index: {}]  }
   0x1 LB: > { %s965_s10 = sadd.s32 4294967295, %s1196_s9   ;;  %p969_p0 = scmp.ge.s32.totalorder %s1196_s9, 1  ;;  %s1196_s9 = sphi %s1214_s9, %s12_s9  }
   0x2   : > { %p125_p1 = scmp.lt.s32.totalorder %s1196_s9, 3 }
   0x4   : > { %p126_p2 = pnand %p969_p0, %p125_p1 }
   0x5   : > { %s154_s11 = smul.u32 (!%p126_p2), 40, %s965_s10  ;;  %v1198_v0 = vmov (!%p126_p2), 0   ;;  %vm815_vm0 = vcmask (!%p126_p2), 556032  }
   0x6   : > { %129 = sbr.rel (%p126_p2) target bundleno = 252 (0xfc), region = 28  ;;  %1029 = vset.pattern.permute.xlu1 (!%p126_p2), %v1198_v0  ;;  %1028 = vset.pattern.permute.xlu0 (!%p126_p2), %v1198_v0 }
   0x7   : > { %p155_p3 = scmp.lt.s32.totalorder (!%p126_p2), %s154_s11, 79 }
   0xd   : > { %s1488_s11 = smov (!%p155_p3, %s154_s11), 79 }
   0xe   : > { %s970_s12 = sshll.u32 %s1488_s11, 3  ;;  %s1017_s16 = sshll.u32 %s1488_s11, 4 }
   0xf   : > { %s1228_s15 = scalar_lea.vmem %s1484_s0, %s970_s12  ;;  %s1274_s19 = scalar_lea.vmem %s1485_s1, %s1017_s16 }
  0x10   : > { %v176_v1 = vld [vmem:[%s1228_s15 + $0x10] sm:$0xff]  ;;  %v174_v2 = vld [vmem:[%s1228_s15] sm:$0xff]  ;;  %v177_v3 = vld [vmem:[%s1228_s15 + $0x18] sm:$0xff]  ;;  %s1283_s22 = scalar_lea.vmem %s1486_s2, %s1017_s16 }
  0x11   : > { %v977_v4 = vmul.f32 -1.442695, %v176_v1  ;;  %v975_v5 = vmul.f32 -1.442695, %v174_v2  ;;  %v978_v6 = vmul.f32 -1.442695, %v177_v3 }
  0x12   : > { %v175_v7 = vld [vmem:[%s1228_s15 + $0x8] sm:$0xff]  ;;  %v178_v9 = vld [vmem:[%s1228_s15 + $0x20] sm:$0xff]  ;;  %v181_v13 = vld [vmem:[%s1228_s15 + $0x38] sm:$0xff] }
  0x13   : > { %v179_v8 = vld [vmem:[%s1228_s15 + $0x28] sm:$0xff]  ;;  %1030 = vpow2.f32 %v977_v4  ;;  %v976_v10 = vmul.f32 -1.442695, %v175_v7  ;;  %v979_v12 = vmul.f32 -1.442695, %v178_v9  ;;  %v180_v14 = vld [vmem:[%s1228_s15 + $0x30] sm:$0xff] }
  0x14   : > { %v980_v11 = vmul.f32 -1.442695, %v179_v8  ;;  %1032 = vpow2.f32 %v975_v5  ;;  %v183_v15 = vld [vmem:[%s1228_s15 + $0x48] sm:$0xff]  ;;  %v982_v16 = vmul.f32 -1.442695, %v181_v13  ;;  %v182_v18 = vld [vmem:[%s1228_s15 + $0x40] sm:$0xff] }
  0x15   : > { %1034 = vpow2.f32 %v978_v6  ;;  %v981_v17 = vmul.f32 -1.442695, %v180_v14  ;;  %v185_v19 = vld [vmem:[%s1228_s15 + $0x58] sm:$0xff]  ;;  %v984_v20 = vmul.f32 -1.442695, %v183_v15  ;;  %v184_v21 = vld [vmem:[%s1228_s15 + $0x50] sm:$0xff] }
  0x16   : > { %1036 = vpow2.f32 %v976_v10  ;;  %v983_v22 = vmul.f32 -1.442695, %v182_v18  ;;  %v187_v23 = vld [vmem:[%s1228_s15 + $0x68] sm:$0xff]  ;;  %v986_v24 = vmul.f32 -1.442695, %v185_v19  ;;  %v186_v46 = vld [vmem:[%s1228_s15 + $0x60] sm:$0xff] }
  0x17   : > { %1038 = vpow2.f32 %v980_v11  ;;  %v985_v25 = vmul.f32 -1.442695, %v184_v21  ;;  %v988_v26 = vmul.f32 -1.442695, %v187_v23  ;;  %v189_v49 = vld [vmem:[%s1228_s15 + $0x78] sm:$0xff]  ;;  %v188_v52 = vld [vmem:[%s1228_s15 + $0x70] sm:$0xff] }
  0x18   : > { %1040 = vpow2.f32 %v979_v12  ;;  %v987_v55 = vmul.f32 -1.442695, %v186_v46  ;;  %v191_v56 = vld [vmem:[%s1228_s15 + $0x88] sm:$0xff]  ;;  %v990_v59 = vmul.f32 -1.442695, %v189_v49  ;;  %v190_v60 = vld [vmem:[%s1228_s15 + $0x80] sm:$0xff] }
  0x19   : > { %1042 = vpow2.f32 %v982_v16  ;;  %v989_v62 = vmul.f32 -1.442695, %v188_v52  ;;  %v193_v63 = vld [vmem:[%s1228_s15 + $0x98] sm:$0xff]  ;;  %v992_v1 = vmul.f32 -1.442695, %v191_v56  ;;  %v192_v2 = vld [vmem:[%s1228_s15 + $0x90] sm:$0xff] }
  0x1a   : > { %1044 = vpow2.f32 %v981_v17  ;;  %v991_v4 = vmul.f32 -1.442695, %v190_v60  ;;  %v195_v5 = vld [vmem:[%s1228_s15 + $0xa8] sm:$0xff]  ;;  %v994_v7 = vmul.f32 -1.442695, %v193_v63  ;;  %v194_v8 = vld [vmem:[%s1228_s15 + $0xa0] sm:$0xff] }
  0x1b   : > { %1046 = vpow2.f32 %v984_v20  ;;  %v993_v10 = vmul.f32 -1.442695, %v192_v2  ;;  %v197_v11 = vld [vmem:[%s1228_s15 + $0xb8] sm:$0xff]  ;;  %v996_v13 = vmul.f32 -1.442695, %v195_v5  ;;  %v196_v14 = vld [vmem:[%s1228_s15 + $0xb0] sm:$0xff] }
  0x1c   : > { %1048 = vpow2.f32 %v983_v22  ;;  %v995_v16 = vmul.f32 -1.442695, %v194_v8  ;;  %v998_v18 = vmul.f32 -1.442695, %v197_v11  ;;  %v997_v20 = vmul.f32 -1.442695, %v196_v14 }
  0x1d   : > { %v1031_v27 = vpop.eup %1030  ;;  %1050 = vpow2.f32 %v986_v24  ;;  %v199_v24 = vld [vmem:[%s1228_s15 + $0xc8] sm:$0xff]  ;;  %v204_v60 = vld [vmem:[%s1228_s15 + $0xf0] sm:$0xff] }
  0x1e   : > { %v1033_v28 = vpop.eup %1032  ;;  %v416_v29 = vadd.f32 1.0, %v1031_v27  ;;  %1052 = vpow2.f32 %v985_v25  ;;  %v203_v52 = vld [vmem:[%s1228_s15 + $0xe8] sm:$0xff] }
  0x1f   : > { %v1035_v30 = vpop.eup %1034  ;;  %v414_v31 = vadd.f32 1.0, %v1033_v28  ;;  %1054 = vpow2.f32 %v988_v26  ;;  %v198_v28 = vld [vmem:[%s1228_s15 + $0xc0] sm:$0xff]  ;;  %v207_v63 = vld [vmem:[%s1228_s15 + $0x108] sm:$0xff] }
  0x20   : > { %v1037_v32 = vpop.eup %1036  ;;  %1056 = vrcp.f32 %v416_v29  ;;  %v417_v33 = vadd.f32 1.0, %v1035_v30 }
  0x21   : > { %v1039_v34 = vpop.eup %1038  ;;  %1058 = vrcp.f32 %v414_v31  ;;  %v415_v35 = vadd.f32 1.0, %v1037_v32  ;;  %v1000_v31 = vmul.f32 -1.442695, %v199_v24 }
  0x22   : > { %v1041_v36 = vpop.eup %1040  ;;  %1060 = vrcp.f32 %v417_v33  ;;  %v419_v37 = vadd.f32 1.0, %v1039_v34 }
  0x23   : > { %v1043_v38 = vpop.eup %1042  ;;  %1062 = vrcp.f32 %v415_v35  ;;  %v418_v39 = vadd.f32 1.0, %v1041_v36  ;;  %v999_v36 = vmul.f32 -1.442695, %v198_v28 }
  0x24   : > { %v1045_v40 = vpop.eup %1044  ;;  %1064 = vrcp.f32 %v419_v37  ;;  %v421_v41 = vadd.f32 1.0, %v1043_v38 }
  0x25   : > { %v1047_v42 = vpop.eup %1046  ;;  %1066 = vrcp.f32 %v418_v39  ;;  %v420_v43 = vadd.f32 1.0, %v1045_v40 }
  0x26   : > { %v1049_v44 = vpop.eup %1048  ;;  %1068 = vrcp.f32 %v421_v41  ;;  %v423_v45 = vadd.f32 1.0, %v1047_v42 }
  0x27   : > { %v1051_v47 = vpop.eup %1050  ;;  %1070 = vrcp.f32 %v420_v43  ;;  %v422_v48 = vadd.f32 1.0, %v1049_v44 }
  0x28   : > { %v1053_v50 = vpop.eup %1052  ;;  %1072 = vrcp.f32 %v423_v45  ;;  %v425_v51 = vadd.f32 1.0, %v1051_v47  ;;  %v201_v47 = vld [vmem:[%s1228_s15 + $0xd8] sm:$0xff] }
  0x29   : > { %v1055_v53 = vpop.eup %1054  ;;  %1074 = vrcp.f32 %v422_v48  ;;  %v424_v54 = vadd.f32 1.0, %v1053_v50  ;;  %v200_v50 = vld [vmem:[%s1228_s15 + $0xd0] sm:$0xff] }
  0x2a   : > { %v1057_v57 = vpop.eup %1056  ;;  %1076 = vrcp.f32 %v425_v51  ;;  %v427_v58 = vadd.f32 1.0, %v1055_v53  ;;  %v1002_v53 = vmul.f32 -1.442695, %v201_v47  ;;  %v1001_v56 = vmul.f32 -1.442695, %v200_v50 }
  0x2b   : > { %v1059_v61 = vpop.eup %1058  ;;  %546 = vperm.xlu1 %1029, %v1057_v57   ;;  %1078 = vrcp.f32 %v424_v54  ;;  %v202_v54 = vld [vmem:[%s1228_s15 + $0xe0] sm:$0xff]  ;;  %v205_v57 = vld [vmem:[%s1228_s15 + $0xf8] sm:$0xff] }
  0x2c   : > { %v1061_v0 = vpop.eup %1060  ;;  %536 = vperm.xlu0 %1028, %v1059_v61   ;;  %1080 = vrcp.f32 %v427_v58 }
  0x2d   : > { %v1063_v3 = vpop.eup %1062  ;;  %1082 = vpow2.f32 %v987_v55 }
  0x2e   : > { %v1065_v6 = vpop.eup %1064  ;;  %1084 = vpow2.f32 %v990_v59  ;;  %v1004_v59 = vmul.f32 -1.442695, %v203_v52 }
  0x2f   : > { %v1067_v9 = vpop.eup %1066  ;;  %551 = vperm.xlu1 %1029, %v1061_v0   ;;  %1086 = vpow2.f32 %v989_v62  ;;  %v1003_v62 = vmul.f32 -1.442695, %v202_v54 }
  0x30   : > { %v1069_v12 = vpop.eup %1068  ;;  %541 = vperm.xlu0 %1028, %v1063_v3   ;;  %1088 = vpow2.f32 %v992_v1  ;;  %v1006_v1 = vmul.f32 -1.442695, %v205_v57  ;;  %v1005_v3 = vmul.f32 -1.442695, %v204_v60 }
  0x31   : > { %v1071_v15 = vpop.eup %1070  ;;  %1090 = vpow2.f32 %v991_v4  ;;  %v206_v4 = vld [vmem:[%s1228_s15 + $0x100] sm:$0xff] }
  0x32   : > { %v1073_v17 = vpop.eup %1072  ;;  %1092 = vpow2.f32 %v994_v7  ;;  %v1007_v11 = vmul.f32 -1.442695, %v206_v4 }
  0x33   : > { %v1075_v19 = vpop.eup %1074  ;;  %561 = vperm.xlu1 %1029, %v1065_v6   ;;  %1094 = vpow2.f32 %v993_v10  ;;  %v1008_v6 = vmul.f32 -1.442695, %v207_v63 }
  0x34   : > { %v1077_v21 = vpop.eup %1076  ;;  %556 = vperm.xlu0 %1028, %v1067_v9   ;;  %1096 = vpow2.f32 %v996_v13  ;;  %v209_v9 = vld [vmem:[%s1228_s15 + $0x118] sm:$0xff] }
  0x35   : > { %v1079_v22 = vpop.eup %1078  ;;  %1098 = vpow2.f32 %v995_v16 }
  0x36   : > { %v1081_v23 = vpop.eup %1080  ;;  %1100 = vpow2.f32 %v998_v18 }
  0x37   : > { %v1083_v25 = vpop.eup %1082  ;;  %571 = vperm.xlu1 %1029, %v1069_v12   ;;  %1102 = vpow2.f32 %v997_v20  ;;  %v208_v12 = vld [vmem:[%s1228_s15 + $0x110] sm:$0xff] }
  0x38   : > { %v1085_v26 = vpop.eup %1084  ;;  %566 = vperm.xlu0 %1028, %v1071_v15   ;;  %v426_v27 = vadd.f32 1.0, %v1083_v25  ;;  %v211_v15 = vld [vmem:[%s1228_s15 + $0x128] sm:$0xff] }
  0x39   : > { %v1087_v29 = vpop.eup %1086  ;;  %v429_v30 = vadd.f32 1.0, %v1085_v26 }
  0x3a   : > { %v1089_v32 = vpop.eup %1088  ;;  %1104 = vrcp.f32 %v426_v27  ;;  %v428_v33 = vadd.f32 1.0, %v1087_v29  ;;  %v213_v27 = vld [vmem:[%s1228_s15 + $0x138] sm:$0xff] }
  0x3b   : > { %v1091_v34 = vpop.eup %1090  ;;  %581 = vperm.xlu1 %1029, %v1073_v17   ;;  %1106 = vrcp.f32 %v429_v30  ;;  %v431_v35 = vadd.f32 1.0, %v1089_v32  ;;  %v1010_v17 = vmul.f32 -1.442695, %v209_v9  ;;  %v218_v9 = vld [vmem:[%s1274_s19 + $0x20] sm:$0xff] }
  0x3c   : > { %v1093_v37 = vpop.eup %1092  ;;  %576 = vperm.xlu0 %1028, %v1075_v19   ;;  %1108 = vrcp.f32 %v428_v33  ;;  %v430_v38 = vadd.f32 1.0, %v1091_v34  ;;  %v1009_v19 = vmul.f32 -1.442695, %v208_v12  ;;  %v215_v12 = vld [vmem:[%s1274_s19 + $0x8] sm:$0xff] }
  0x3d   : > { %v1095_v39 = vpop.eup %1094  ;;  %v433_v40 = vadd.f32 1.0, %v1093_v37  ;;  %1110 = vpow2.f32 %v1000_v31 }
  0x3e   : > { %v1097_v41 = vpop.eup %1096  ;;  %1112 = vrcp.f32 %v431_v35  ;;  %v432_v42 = vadd.f32 1.0, %v1095_v39  ;;  %v1014_v35 = vmul.f32 -1.442695, %v213_v27 }
  0x3f   : > { %v1099_v43 = vpop.eup %1098  ;;  %591 = vperm.xlu1 %1029, %v1077_v21   ;;  %v435_v44 = vadd.f32 1.0, %v1097_v41  ;;  %1114 = vpow2.f32 %v999_v36  ;;  %v1012_v21 = vmul.f32 -1.442695, %v211_v15 }
  0x40   : > { %v1101_v45 = vpop.eup %1100  ;;  %586 = vperm.xlu0 %1028, %v1079_v22   ;;  %1116 = vrcp.f32 %v430_v38  ;;  %v434_v46 = vadd.f32 1.0, %v1099_v43 }
  0x41   : > { %v1103_v48 = vpop.eup %1102  ;;  %1118 = vrcp.f32 %v433_v40  ;;  %v437_v49 = vadd.f32 1.0, %v1101_v45 }
  0x42   : > { %1120 = vrcp.f32 %v432_v42  ;;  %v436_v51 = vadd.f32 1.0, %v1103_v48 }
  0x43   : > { %601 = vperm.xlu1 %1029, %v1081_v23   ;;  %1122 = vrcp.f32 %v435_v44  ;;  %v210_v23 = vld [vmem:[%s1228_s15 + $0x120] sm:$0xff]  ;;  %v212_v44 = vld [vmem:[%s1228_s15 + $0x130] sm:$0xff] }
  0x44   : > { %v1105_v55 = vpop.eup %1104  ;;  %1124 = vrcp.f32 %v434_v46  ;;  %v1011_v30 = vmul.f32 -1.442695, %v210_v23 }
  0x45   : > { %v1107_v58 = vpop.eup %1106  ;;  %596 = vperm.xlu0 %1028, %v1105_v55   ;;  %1126 = vrcp.f32 %v437_v49  ;;  %v1013_v49 = vmul.f32 -1.442695, %v212_v44 }
  0x46   : > { %v1109_v61 = vpop.eup %1108  ;;  %1128 = vrcp.f32 %v436_v51 }
  0x47   : > { %v1111_v0 = vpop.eup %1110  ;;  %611 = vperm.xlu1 %1029, %v1107_v58   ;;  %1130 = vpow2.f32 %v1002_v53 }
  0x48   : > { %v1113_v2 = vpop.eup %1112  ;;  %1132 = vpow2.f32 %v1001_v56  ;;  %v439_v8 = vadd.f32 1.0, %v1111_v0 }
  0x49   : > { %v1115_v5 = vpop.eup %1114  ;;  %606 = vperm.xlu0 %1028, %v1109_v61   ;;  %1134 = vpow2.f32 %v1004_v59 }
  0x4a   : > { %v1117_v7 = vpop.eup %1116  ;;  %1136 = vpow2.f32 %v1003_v62  ;;  %v438_v14 = vadd.f32 1.0, %v1115_v5 }
  0x4b   : > { %v1119_v10 = vpop.eup %1118  ;;  %621 = vperm.xlu1 %1029, %v1113_v2   ;;  %1138 = vpow2.f32 %v1006_v1 }
  0x4c   : > { %v1121_v13 = vpop.eup %1120  ;;  %1140 = vpow2.f32 %v1005_v3 }
  0x4d   : > { %v1123_v16 = vpop.eup %1122  ;;  %616 = vperm.xlu0 %1028, %v1117_v7   ;;  %1142 = vpow2.f32 %v1008_v6 }
  0x4e   : > { %v1125_v18 = vpop.eup %1124  ;;  %1144 = vrcp.f32 %v439_v8 }
  0x4f   : > { %v1127_v20 = vpop.eup %1126  ;;  %631 = vperm.xlu1 %1029, %v1119_v10   ;;  %1146 = vpow2.f32 %v1007_v11  ;;  %v219_v10 = vld [vmem:[%s1274_s19 + $0x28] sm:$0xff]  ;;  %v214_v11 = vld [vmem:[%s1274_s19] sm:$0xff] }
  0x50   : > { %v1129_v22 = vpop.eup %1128  ;;  %1148 = vrcp.f32 %v438_v14 }
  0x51   : > { %v1131_v24 = vpop.eup %1130  ;;  %626 = vperm.xlu0 %1028, %v1121_v13   ;;  %1150 = vpow2.f32 %v1010_v17 }
  0x52   : > { %v1133_v25 = vpop.eup %1132  ;;  %v441_v26 = vadd.f32 1.0, %v1131_v24  ;;  %1152 = vpow2.f32 %v1009_v19  ;;  %v220_v19 = vld [vmem:[%s1274_s19 + $0x30] sm:$0xff] }
  0x53   : > { %v1135_v28 = vpop.eup %1134  ;;  %641 = vperm.xlu1 %1029, %v1123_v16   ;;  %v440_v29 = vadd.f32 1.0, %v1133_v25  ;;  %1154 = vpow2.f32 %v1012_v21  ;;  %v216_v21 = vld [vmem:[%s1274_s19 + $0x10] sm:$0xff] }
  0x54   : > { %v1137_v31 = vpop.eup %1136  ;;  %1156 = vrcp.f32 %v441_v26  ;;  %v443_v32 = vadd.f32 1.0, %v1135_v28 }
  0x55   : > { %v1139_v33 = vpop.eup %1138  ;;  %636 = vperm.xlu0 %1028, %v1125_v18   ;;  %1158 = vrcp.f32 %v440_v29  ;;  %v442_v34 = vadd.f32 1.0, %v1137_v31  ;;  %v224_v29 = vld [vmem:[%s1274_s19 + $0x50] sm:$0xff]  ;;  %v222_v31 = vld [vmem:[%s1274_s19 + $0x40] sm:$0xff] }
  0x56   : > { %v1141_v36 = vpop.eup %1140  ;;  %1160 = vrcp.f32 %v443_v32  ;;  %v445_v37 = vadd.f32 1.0, %v1139_v33  ;;  %v223_v32 = vld [vmem:[%s1274_s19 + $0x48] sm:$0xff] }
  0x57   : > { %v1143_v38 = vpop.eup %1142  ;;  %651 = vperm.xlu1 %1029, %v1127_v20   ;;  %1162 = vpow2.f32 %v1011_v30  ;;  %v444_v40 = vadd.f32 1.0, %v1141_v36  ;;  %v221_v20 = vld [vmem:[%s1274_s19 + $0x38] sm:$0xff] }
  0x58   : > { %v1145_v39 = vpop.eup %1144  ;;  %1164 = vrcp.f32 %v442_v34  ;;  %v447_v43 = vadd.f32 1.0, %v1143_v38  ;;  %v225_v30 = vld [vmem:[%s1274_s19 + $0x58] sm:$0xff] }
  0x59   : > { %v1147_v41 = vpop.eup %1146  ;;  %646 = vperm.xlu0 %1028, %v1129_v22   ;;  %1166 = vpow2.f32 %v1014_v35  ;;  %v217_v22 = vld [vmem:[%s1274_s19 + $0x18] sm:$0xff] }
  0x5a   : > { %v1149_v42 = vpop.eup %1148  ;;  %1168 = vrcp.f32 %v445_v37  ;;  %v446_v47 = vadd.f32 1.0, %v1147_v41  ;;  %v226_v41 = vld [vmem:[%s1274_s19 + $0x60] sm:$0xff] }
  0x5b   : > { %v1151_v45 = vpop.eup %1150  ;;  %661 = vperm.xlu1 %1029, %v1145_v39   ;;  %1170 = vrcp.f32 %v444_v40  ;;  %v228_v39 = vld [vmem:[%s1274_s19 + $0x70] sm:$0xff]  ;;  %v229_v40 = vld [vmem:[%s1274_s19 + $0x78] sm:$0xff] }
  0x5c   : > { %v1153_v46 = vpop.eup %1152  ;;  %1172 = vrcp.f32 %v447_v43  ;;  %v449_v51 = vadd.f32 1.0, %v1151_v45 }
  0x5d   : > { %v1155_v48 = vpop.eup %1154  ;;  %656 = vperm.xlu0 %1028, %v1149_v42   ;;  %1174 = vrcp.f32 %v446_v47  ;;  %v448_v54 = vadd.f32 1.0, %v1153_v46  ;;  %v227_v42 = vld [vmem:[%s1274_s19 + $0x68] sm:$0xff] }
  0x5e   : > { %v1157_v50 = vpop.eup %1156  ;;  %1176 = vpow2.f32 %v1013_v49  ;;  %v451_v57 = vadd.f32 1.0, %v1155_v48  ;;  %v232_v49 = vld [vmem:[%s1274_s19 + $0x90] sm:$0xff] }
  0x5f   : > { %v1159_v52 = vpop.eup %1158  ;;  %671 = vperm.xlu1 %1029, %v1157_v50   ;;  %1178 = vrcp.f32 %v449_v51  ;;  %v233_v50 = vld [vmem:[%s1274_s19 + $0x98] sm:$0xff]  ;;  %v230_v51 = vld [vmem:[%s1274_s19 + $0x80] sm:$0xff] }
  0x60   : > { %v1161_v53 = vpop.eup %1160  ;;  %1180 = vrcp.f32 %v448_v54 }
  0x61   : > { %v1163_v55 = vpop.eup %1162  ;;  %666 = vperm.xlu0 %1028, %v1159_v52   ;;  %1182 = vrcp.f32 %v451_v57  ;;  %v231_v52 = vld [vmem:[%s1274_s19 + $0x88] sm:$0xff] }
  0x62   : > { %v1165_v56 = vpop.eup %1164  ;;  %v450_v60 = vadd.f32 1.0, %v1163_v55 }
  0x63   : > { %v1167_v58 = vpop.eup %1166  ;;  %681 = vperm.xlu1 %1029, %v1161_v53  }
  0x64   : > { %v1169_v59 = vpop.eup %1168  ;;  %v453_v62 = vadd.f32 1.0, %v1167_v58  ;;  %1184 = vrcp.f32 %v450_v60  ;;  %v237_v60 = vld [vmem:[%s1274_s19 + $0xb8] sm:$0xff] }
  0x65   : > { %676 = vperm.xlu0 %1028, %v1165_v56   ;;  %v1171_v61 = vpop.eup %1170 }
  0x66   : > { %v1173_v63 = vpop.eup %1172  ;;  %1186 = vrcp.f32 %v453_v62  ;;  %v235_v62 = vld [vmem:[%s1274_s19 + $0xa8] sm:$0xff] }
  0x67   : > { %691 = vperm.xlu1 %1029, %v1169_v59   ;;  %v1175_v0 = vpop.eup %1174  ;;  %v236_v59 = vld [vmem:[%s1274_s19 + $0xb0] sm:$0xff] }
  0x68   : > { %v1177_v1 = vpop.eup %1176 }
  0x69   : > { %686 = vperm.xlu0 %1028, %v1171_v61   ;;  %v1179_v2 = vpop.eup %1178  ;;  %v452_v3 = vadd.f32 1.0, %v1177_v1  ;;  %v234_v61 = vld [vmem:[%s1274_s19 + $0xa0] sm:$0xff] }
  0x6a   : > { %v1181_v4 = vpop.eup %1180 }
  0x6b   : > { %701 = vperm.xlu1 %1029, %v1173_v63   ;;  %1188 = vrcp.f32 %v452_v3  ;;  %v1183_v5 = vpop.eup %1182 }
  0x6d   : > { %696 = vperm.xlu0 %1028, %v1175_v0  }
  0x6e   : > { %v1185_v6 = vpop.eup %1184 }
  0x6f   : > { %711 = vperm.xlu1 %1029, %v1179_v2  }
  0x70   : > { %v1187_v7 = vpop.eup %1186 }
  0x71   : > { %706 = vperm.xlu0 %1028, %v1181_v4  }
  0x73   : > { %721 = vperm.xlu1 %1029, %v1183_v5   ;;  %v240_v5 = vld [vmem:[%s1274_s19 + $0xd0] sm:$0xff] }
  0x75   : > { %716 = vperm.xlu0 %1028, %v1185_v6   ;;  %v1189_v8 = vpop.eup %1188  ;;  %v241_v6 = vld [vmem:[%s1274_s19 + $0xd8] sm:$0xff] }
  0x77   : > { %731 = vperm.xlu1 %1029, %v1187_v7  }
  0x79   : > { %726 = vperm.xlu0 %1028, %v1189_v8   ;;  %v238_v8 = vld [vmem:[%s1274_s19 + $0xc0] sm:$0xff] }
  0xaa   : > { %v547_v13 = vpop.permute.xlu1 %546 }
  0xab   : > { %v738_v14 = vmul.f32 %v547_v13, %v218_v9  ;;  %v739_v15 = vmul.f32 %v547_v13, %v219_v10  ;;  %v537_v16 = vpop.permute.xlu0 %536  ;;  %v239_v9 = vld [vmem:[%s1274_s19 + $0xc8] sm:$0xff]  ;;  %v244_v13 = vld [vmem:[%s1274_s19 + $0xf0] sm:$0xff] }
  0xac   : > { %v734_v17 = vmul.f32 %v537_v16, %v214_v11  ;;  %v735_v18 = vmul.f32 %v537_v16, %v215_v12 }
  0xad   : > { %819 = vst [vmem:[%s1283_s22 + $0x20] sm:$0xff] %v738_v14  ;;  %820 = vst.msk [vmem:[%s1283_s22 + $0x28] sm:$0xff] %vm815_vm0, %v739_v15  ;;  %v245_v14 = vld [vmem:[%s1274_s19 + $0xf8] sm:$0xff] }
  0xae   : > { %814 = vst [vmem:[%s1283_s22] sm:$0xff] %v734_v17  ;;  %816 = vst.msk [vmem:[%s1283_s22 + $0x8] sm:$0xff] %vm815_vm0, %v735_v18  ;;  %v552_v23 = vpop.permute.xlu1 %551  ;;  %v242_v18 = vld [vmem:[%s1274_s19 + $0xe0] sm:$0xff] }
  0xaf   : > { %v740_v24 = vmul.f32 %v552_v23, %v220_v19  ;;  %v741_v25 = vmul.f32 %v552_v23, %v221_v20  ;;  %v542_v26 = vpop.permute.xlu0 %541  ;;  %v243_v19 = vld [vmem:[%s1274_s19 + $0xe8] sm:$0xff]  ;;  %v248_v23 = vld [vmem:[%s1274_s19 + $0x110] sm:$0xff] }
  0xb0   : > { %v736_v27 = vmul.f32 %v542_v26, %v216_v21  ;;  %v737_v28 = vmul.f32 %v542_v26, %v217_v22 }
  0xb1   : > { %821 = vst [vmem:[%s1283_s22 + $0x30] sm:$0xff] %v740_v24  ;;  %822 = vst.msk [vmem:[%s1283_s22 + $0x38] sm:$0xff] %vm815_vm0, %v741_v25  ;;  %v249_v24 = vld [vmem:[%s1274_s19 + $0x118] sm:$0xff] }
  0xb2   : > { %817 = vst [vmem:[%s1283_s22 + $0x10] sm:$0xff] %v736_v27  ;;  %818 = vst.msk [vmem:[%s1283_s22 + $0x18] sm:$0xff] %vm815_vm0, %v737_v28  ;;  %v562_v33 = vpop.permute.xlu1 %561  ;;  %v246_v28 = vld [vmem:[%s1274_s19 + $0x100] sm:$0xff] }
  0xb3   : > { %v744_v34 = vmul.f32 %v562_v33, %v224_v29  ;;  %v745_v35 = vmul.f32 %v562_v33, %v225_v30  ;;  %v557_v36 = vpop.permute.xlu0 %556  ;;  %v247_v29 = vld [vmem:[%s1274_s19 + $0x108] sm:$0xff]  ;;  %v252_v33 = vld [vmem:[%s1274_s19 + $0x130] sm:$0xff] }
  0xb4   : > { %v742_v37 = vmul.f32 %v557_v36, %v222_v31  ;;  %v743_v38 = vmul.f32 %v557_v36, %v223_v32 }
  0xb5   : > { %825 = vst [vmem:[%s1283_s22 + $0x50] sm:$0xff] %v744_v34  ;;  %826 = vst.msk [vmem:[%s1283_s22 + $0x58] sm:$0xff] %vm815_vm0, %v745_v35  ;;  %v253_v34 = vld [vmem:[%s1274_s19 + $0x138] sm:$0xff] }
  0xb6   : > { %823 = vst [vmem:[%s1283_s22 + $0x40] sm:$0xff] %v742_v37  ;;  %824 = vst.msk [vmem:[%s1283_s22 + $0x48] sm:$0xff] %vm815_vm0, %v743_v38  ;;  %v572_v43 = vpop.permute.xlu1 %571  ;;  %v250_v38 = vld [vmem:[%s1274_s19 + $0x120] sm:$0xff] }
  0xb7   : > { %v748_v44 = vmul.f32 %v572_v43, %v228_v39  ;;  %v749_v45 = vmul.f32 %v572_v43, %v229_v40  ;;  %v567_v46 = vpop.permute.xlu0 %566  ;;  %v251_v39 = vld [vmem:[%s1274_s19 + $0x128] sm:$0xff]  ;;  %v256_v43 = vld [vmem:[%s1274_s19 + $0x150] sm:$0xff] }
  0xb8   : > { %v746_v47 = vmul.f32 %v567_v46, %v226_v41  ;;  %v747_v48 = vmul.f32 %v567_v46, %v227_v42 }
  0xb9   : > { %829 = vst [vmem:[%s1283_s22 + $0x70] sm:$0xff] %v748_v44  ;;  %830 = vst.msk [vmem:[%s1283_s22 + $0x78] sm:$0xff] %vm815_vm0, %v749_v45  ;;  %v257_v44 = vld [vmem:[%s1274_s19 + $0x158] sm:$0xff] }
  0xba   : > { %827 = vst [vmem:[%s1283_s22 + $0x60] sm:$0xff] %v746_v47  ;;  %828 = vst.msk [vmem:[%s1283_s22 + $0x68] sm:$0xff] %vm815_vm0, %v747_v48  ;;  %v582_v53 = vpop.permute.xlu1 %581  ;;  %v254_v48 = vld [vmem:[%s1274_s19 + $0x140] sm:$0xff] }
  0xbb   : > { %v752_v54 = vmul.f32 %v582_v53, %v232_v49  ;;  %v753_v55 = vmul.f32 %v582_v53, %v233_v50  ;;  %v577_v56 = vpop.permute.xlu0 %576  ;;  %v255_v49 = vld [vmem:[%s1274_s19 + $0x148] sm:$0xff]  ;;  %v260_v53 = vld [vmem:[%s1274_s19 + $0x170] sm:$0xff] }
  0xbc   : > { %v750_v57 = vmul.f32 %v577_v56, %v230_v51  ;;  %v751_v58 = vmul.f32 %v577_v56, %v231_v52 }
  0xbd   : > { %833 = vst [vmem:[%s1283_s22 + $0x90] sm:$0xff] %v752_v54  ;;  %834 = vst.msk [vmem:[%s1283_s22 + $0x98] sm:$0xff] %vm815_vm0, %v753_v55  ;;  %v261_v54 = vld [vmem:[%s1274_s19 + $0x178] sm:$0xff] }
  0xbe   : > { %831 = vst [vmem:[%s1283_s22 + $0x80] sm:$0xff] %v750_v57  ;;  %832 = vst.msk [vmem:[%s1283_s22 + $0x88] sm:$0xff] %vm815_vm0, %v751_v58  ;;  %v592_v63 = vpop.permute.xlu1 %591  ;;  %v258_v58 = vld [vmem:[%s1274_s19 + $0x160] sm:$0xff] }
  0xbf   : > { %v756_v0 = vmul.f32 %v592_v63, %v236_v59  ;;  %v757_v1 = vmul.f32 %v592_v63, %v237_v60  ;;  %v587_v2 = vpop.permute.xlu0 %586  ;;  %v259_v59 = vld [vmem:[%s1274_s19 + $0x168] sm:$0xff]  ;;  %v264_v63 = vld [vmem:[%s1274_s19 + $0x190] sm:$0xff] }
  0xc0   : > { %v754_v3 = vmul.f32 %v587_v2, %v234_v61  ;;  %v755_v4 = vmul.f32 %v587_v2, %v235_v62 }
  0xc1   : > { %837 = vst [vmem:[%s1283_s22 + $0xb0] sm:$0xff] %v756_v0  ;;  %838 = vst.msk [vmem:[%s1283_s22 + $0xb8] sm:$0xff] %vm815_vm0, %v757_v1  ;;  %v265_v0 = vld [vmem:[%s1274_s19 + $0x198] sm:$0xff] }
  0xc2   : > { %835 = vst [vmem:[%s1283_s22 + $0xa0] sm:$0xff] %v754_v3  ;;  %836 = vst.msk [vmem:[%s1283_s22 + $0xa8] sm:$0xff] %vm815_vm0, %v755_v4  ;;  %v602_v7 = vpop.permute.xlu1 %601  ;;  %v262_v4 = vld [vmem:[%s1274_s19 + $0x180] sm:$0xff] }
  0xc3   : > { %v760_v10 = vmul.f32 %v602_v7, %v240_v5  ;;  %v761_v11 = vmul.f32 %v602_v7, %v241_v6  ;;  %v263_v5 = vld [vmem:[%s1274_s19 + $0x188] sm:$0xff] }
  0xc4   : > { %v597_v12 = vpop.permute.xlu0 %596 }
  0xc5   : > { %841 = vst [vmem:[%s1283_s22 + $0xd0] sm:$0xff] %v760_v10  ;;  %842 = vst.msk [vmem:[%s1283_s22 + $0xd8] sm:$0xff] %vm815_vm0, %v761_v11  ;;  %v758_v15 = vmul.f32 %v597_v12, %v238_v8  ;;  %v759_v16 = vmul.f32 %v597_v12, %v239_v9  ;;  %v268_v9 = vld [vmem:[%s1274_s19 + $0x1b0] sm:$0xff]  ;;  %v269_v10 = vld [vmem:[%s1274_s19 + $0x1b8] sm:$0xff] }
  0xc6   : > { %v612_v17 = vpop.permute.xlu1 %611 }
  0xc7   : > { %839 = vst [vmem:[%s1283_s22 + $0xc0] sm:$0xff] %v758_v15  ;;  %840 = vst.msk [vmem:[%s1283_s22 + $0xc8] sm:$0xff] %vm815_vm0, %v759_v16  ;;  %v764_v20 = vmul.f32 %v612_v17, %v244_v13  ;;  %v765_v21 = vmul.f32 %v612_v17, %v245_v14  ;;  %v266_v14 = vld [vmem:[%s1274_s19 + $0x1a0] sm:$0xff]  ;;  %v267_v15 = vld [vmem:[%s1274_s19 + $0x1a8] sm:$0xff] }
  0xc8   : > { %v607_v22 = vpop.permute.xlu0 %606 }
  0xc9   : > { %845 = vst [vmem:[%s1283_s22 + $0xf0] sm:$0xff] %v764_v20  ;;  %846 = vst.msk [vmem:[%s1283_s22 + $0xf8] sm:$0xff] %vm815_vm0, %v765_v21  ;;  %v762_v25 = vmul.f32 %v607_v22, %v242_v18  ;;  %v763_v26 = vmul.f32 %v607_v22, %v243_v19  ;;  %v272_v19 = vld [vmem:[%s1274_s19 + $0x1d0] sm:$0xff]  ;;  %v273_v20 = vld [vmem:[%s1274_s19 + $0x1d8] sm:$0xff] }
  0xca   : > { %v622_v27 = vpop.permute.xlu1 %621 }
  0xcb   : > { %843 = vst [vmem:[%s1283_s22 + $0xe0] sm:$0xff] %v762_v25  ;;  %844 = vst.msk [vmem:[%s1283_s22 + $0xe8] sm:$0xff] %vm815_vm0, %v763_v26  ;;  %v768_v30 = vmul.f32 %v622_v27, %v248_v23  ;;  %v769_v31 = vmul.f32 %v622_v27, %v249_v24  ;;  %v270_v24 = vld [vmem:[%s1274_s19 + $0x1c0] sm:$0xff]  ;;  %v271_v25 = vld [vmem:[%s1274_s19 + $0x1c8] sm:$0xff] }
  0xcc   : > { %v617_v32 = vpop.permute.xlu0 %616 }
  0xcd   : > { %849 = vst [vmem:[%s1283_s22 + $0x110] sm:$0xff] %v768_v30  ;;  %850 = vst.msk [vmem:[%s1283_s22 + $0x118] sm:$0xff] %vm815_vm0, %v769_v31  ;;  %v766_v35 = vmul.f32 %v617_v32, %v246_v28  ;;  %v767_v36 = vmul.f32 %v617_v32, %v247_v29  ;;  %v276_v29 = vld [vmem:[%s1274_s19 + $0x1f0] sm:$0xff]  ;;  %v277_v30 = vld [vmem:[%s1274_s19 + $0x1f8] sm:$0xff] }
  0xce   : > { %v632_v37 = vpop.permute.xlu1 %631 }
  0xcf   : > { %847 = vst [vmem:[%s1283_s22 + $0x100] sm:$0xff] %v766_v35  ;;  %848 = vst.msk [vmem:[%s1283_s22 + $0x108] sm:$0xff] %vm815_vm0, %v767_v36  ;;  %v772_v40 = vmul.f32 %v632_v37, %v252_v33  ;;  %v773_v41 = vmul.f32 %v632_v37, %v253_v34  ;;  %v274_v34 = vld [vmem:[%s1274_s19 + $0x1e0] sm:$0xff]  ;;  %v275_v35 = vld [vmem:[%s1274_s19 + $0x1e8] sm:$0xff] }
  0xd0   : > { %v627_v42 = vpop.permute.xlu0 %626 }
  0xd1   : > { %853 = vst [vmem:[%s1283_s22 + $0x130] sm:$0xff] %v772_v40  ;;  %854 = vst.msk [vmem:[%s1283_s22 + $0x138] sm:$0xff] %vm815_vm0, %v773_v41  ;;  %v770_v45 = vmul.f32 %v627_v42, %v250_v38  ;;  %v771_v46 = vmul.f32 %v627_v42, %v251_v39  ;;  %v280_v39 = vld [vmem:[%s1274_s19 + $0x210] sm:$0xff]  ;;  %v281_v40 = vld [vmem:[%s1274_s19 + $0x218] sm:$0xff] }
  0xd2   : > { %v642_v47 = vpop.permute.xlu1 %641 }
  0xd3   : > { %851 = vst [vmem:[%s1283_s22 + $0x120] sm:$0xff] %v770_v45  ;;  %852 = vst.msk [vmem:[%s1283_s22 + $0x128] sm:$0xff] %vm815_vm0, %v771_v46  ;;  %v776_v50 = vmul.f32 %v642_v47, %v256_v43  ;;  %v777_v51 = vmul.f32 %v642_v47, %v257_v44  ;;  %v278_v44 = vld [vmem:[%s1274_s19 + $0x200] sm:$0xff]  ;;  %v279_v45 = vld [vmem:[%s1274_s19 + $0x208] sm:$0xff] }
  0xd4   : > { %v637_v52 = vpop.permute.xlu0 %636 }
  0xd5   : > { %857 = vst [vmem:[%s1283_s22 + $0x150] sm:$0xff] %v776_v50  ;;  %858 = vst.msk [vmem:[%s1283_s22 + $0x158] sm:$0xff] %vm815_vm0, %v777_v51  ;;  %v774_v55 = vmul.f32 %v637_v52, %v254_v48  ;;  %v775_v56 = vmul.f32 %v637_v52, %v255_v49  ;;  %v284_v49 = vld [vmem:[%s1274_s19 + $0x230] sm:$0xff]  ;;  %v285_v50 = vld [vmem:[%s1274_s19 + $0x238] sm:$0xff] }
  0xd6   : > { %v652_v57 = vpop.permute.xlu1 %651 }
  0xd7   : > { %855 = vst [vmem:[%s1283_s22 + $0x140] sm:$0xff] %v774_v55  ;;  %856 = vst.msk [vmem:[%s1283_s22 + $0x148] sm:$0xff] %vm815_vm0, %v775_v56  ;;  %v780_v60 = vmul.f32 %v652_v57, %v260_v53  ;;  %v781_v61 = vmul.f32 %v652_v57, %v261_v54  ;;  %v282_v54 = vld [vmem:[%s1274_s19 + $0x220] sm:$0xff]  ;;  %v283_v55 = vld [vmem:[%s1274_s19 + $0x228] sm:$0xff] }
  0xd8   : > { %v647_v62 = vpop.permute.xlu0 %646 }
  0xd9   : > { %861 = vst [vmem:[%s1283_s22 + $0x170] sm:$0xff] %v780_v60  ;;  %862 = vst.msk [vmem:[%s1283_s22 + $0x178] sm:$0xff] %vm815_vm0, %v781_v61  ;;  %v778_v1 = vmul.f32 %v647_v62, %v258_v58  ;;  %v779_v2 = vmul.f32 %v647_v62, %v259_v59  ;;  %v288_v59 = vld [vmem:[%s1274_s19 + $0x250] sm:$0xff]  ;;  %v289_v60 = vld [vmem:[%s1274_s19 + $0x258] sm:$0xff] }
  0xda   : > { %v662_v3 = vpop.permute.xlu1 %661 }
  0xdb   : > { %859 = vst [vmem:[%s1283_s22 + $0x160] sm:$0xff] %v778_v1  ;;  %860 = vst.msk [vmem:[%s1283_s22 + $0x168] sm:$0xff] %vm815_vm0, %v779_v2  ;;  %v784_v6 = vmul.f32 %v662_v3, %v264_v63  ;;  %v785_v7 = vmul.f32 %v662_v3, %v265_v0  ;;  %v286_v0 = vld [vmem:[%s1274_s19 + $0x240] sm:$0xff]  ;;  %v287_v1 = vld [vmem:[%s1274_s19 + $0x248] sm:$0xff] }
  0xdc   : > { %v657_v8 = vpop.permute.xlu0 %656 }
  0xdd   : > { %865 = vst [vmem:[%s1283_s22 + $0x190] sm:$0xff] %v784_v6  ;;  %866 = vst.msk [vmem:[%s1283_s22 + $0x198] sm:$0xff] %vm815_vm0, %v785_v7  ;;  %v782_v11 = vmul.f32 %v657_v8, %v262_v4  ;;  %v783_v12 = vmul.f32 %v657_v8, %v263_v5  ;;  %v292_v5 = vld [vmem:[%s1274_s19 + $0x270] sm:$0xff]  ;;  %v293_v6 = vld [vmem:[%s1274_s19 + $0x278] sm:$0xff] }
  0xde   : > { %v672_v13 = vpop.permute.xlu1 %671 }
  0xdf   : > { %863 = vst [vmem:[%s1283_s22 + $0x180] sm:$0xff] %v782_v11  ;;  %864 = vst.msk [vmem:[%s1283_s22 + $0x188] sm:$0xff] %vm815_vm0, %v783_v12  ;;  %v788_v16 = vmul.f32 %v672_v13, %v268_v9  ;;  %v789_v17 = vmul.f32 %v672_v13, %v269_v10  ;;  %v290_v10 = vld [vmem:[%s1274_s19 + $0x260] sm:$0xff]  ;;  %v291_v11 = vld [vmem:[%s1274_s19 + $0x268] sm:$0xff] }
  0xe0   : > { %v667_v18 = vpop.permute.xlu0 %666 }
  0xe1   : > { %869 = vst [vmem:[%s1283_s22 + $0x1b0] sm:$0xff] %v788_v16  ;;  %870 = vst.msk [vmem:[%s1283_s22 + $0x1b8] sm:$0xff] %vm815_vm0, %v789_v17  ;;  %v786_v21 = vmul.f32 %v667_v18, %v266_v14  ;;  %v787_v22 = vmul.f32 %v667_v18, %v267_v15 }
  0xe2   : > { %v682_v23 = vpop.permute.xlu1 %681 }
  0xe3   : > { %867 = vst [vmem:[%s1283_s22 + $0x1a0] sm:$0xff] %v786_v21  ;;  %868 = vst.msk [vmem:[%s1283_s22 + $0x1a8] sm:$0xff] %vm815_vm0, %v787_v22  ;;  %v792_v26 = vmul.f32 %v682_v23, %v272_v19  ;;  %v793_v27 = vmul.f32 %v682_v23, %v273_v20 }
  0xe4   : > { %v677_v28 = vpop.permute.xlu0 %676 }
  0xe5   : > { %873 = vst [vmem:[%s1283_s22 + $0x1d0] sm:$0xff] %v792_v26  ;;  %874 = vst.msk [vmem:[%s1283_s22 + $0x1d8] sm:$0xff] %vm815_vm0, %v793_v27  ;;  %v790_v31 = vmul.f32 %v677_v28, %v270_v24  ;;  %v791_v32 = vmul.f32 %v677_v28, %v271_v25 }
  0xe6   : > { %v692_v33 = vpop.permute.xlu1 %691 }
  0xe7   : > { %871 = vst [vmem:[%s1283_s22 + $0x1c0] sm:$0xff] %v790_v31  ;;  %872 = vst.msk [vmem:[%s1283_s22 + $0x1c8] sm:$0xff] %vm815_vm0, %v791_v32  ;;  %v796_v36 = vmul.f32 %v692_v33, %v276_v29  ;;  %v797_v37 = vmul.f32 %v692_v33, %v277_v30 }
  0xe8   : > { %v687_v38 = vpop.permute.xlu0 %686 }
  0xe9   : > { %877 = vst [vmem:[%s1283_s22 + $0x1f0] sm:$0xff] %v796_v36  ;;  %878 = vst.msk [vmem:[%s1283_s22 + $0x1f8] sm:$0xff] %vm815_vm0, %v797_v37  ;;  %v794_v41 = vmul.f32 %v687_v38, %v274_v34  ;;  %v795_v42 = vmul.f32 %v687_v38, %v275_v35 }
  0xea   : > { %v702_v43 = vpop.permute.xlu1 %701 }
  0xeb   : > { %875 = vst [vmem:[%s1283_s22 + $0x1e0] sm:$0xff] %v794_v41  ;;  %876 = vst.msk [vmem:[%s1283_s22 + $0x1e8] sm:$0xff] %vm815_vm0, %v795_v42  ;;  %v800_v46 = vmul.f32 %v702_v43, %v280_v39  ;;  %v801_v47 = vmul.f32 %v702_v43, %v281_v40 }
  0xec   : > { %v697_v48 = vpop.permute.xlu0 %696 }
  0xed   : > { %881 = vst [vmem:[%s1283_s22 + $0x210] sm:$0xff] %v800_v46  ;;  %882 = vst.msk [vmem:[%s1283_s22 + $0x218] sm:$0xff] %vm815_vm0, %v801_v47  ;;  %v798_v51 = vmul.f32 %v697_v48, %v278_v44  ;;  %v799_v52 = vmul.f32 %v697_v48, %v279_v45 }
  0xee   : > { %v712_v53 = vpop.permute.xlu1 %711 }
  0xef   : > { %879 = vst [vmem:[%s1283_s22 + $0x200] sm:$0xff] %v798_v51  ;;  %880 = vst.msk [vmem:[%s1283_s22 + $0x208] sm:$0xff] %vm815_vm0, %v799_v52  ;;  %v804_v56 = vmul.f32 %v712_v53, %v284_v49  ;;  %v805_v57 = vmul.f32 %v712_v53, %v285_v50 }
  0xf0   : > { %v707_v58 = vpop.permute.xlu0 %706 }
  0xf1   : > { %885 = vst [vmem:[%s1283_s22 + $0x230] sm:$0xff] %v804_v56  ;;  %886 = vst.msk [vmem:[%s1283_s22 + $0x238] sm:$0xff] %vm815_vm0, %v805_v57  ;;  %v802_v61 = vmul.f32 %v707_v58, %v282_v54  ;;  %v803_v62 = vmul.f32 %v707_v58, %v283_v55 }
  0xf2   : > { %v722_v63 = vpop.permute.xlu1 %721 }
  0xf3   : > { %883 = vst [vmem:[%s1283_s22 + $0x220] sm:$0xff] %v802_v61  ;;  %884 = vst.msk [vmem:[%s1283_s22 + $0x228] sm:$0xff] %vm815_vm0, %v803_v62  ;;  %v808_v2 = vmul.f32 %v722_v63, %v288_v59  ;;  %v809_v3 = vmul.f32 %v722_v63, %v289_v60 }
  0xf4   : > { %v717_v4 = vpop.permute.xlu0 %716 }
  0xf5   : > { %889 = vst [vmem:[%s1283_s22 + $0x250] sm:$0xff] %v808_v2  ;;  %890 = vst.msk [vmem:[%s1283_s22 + $0x258] sm:$0xff] %vm815_vm0, %v809_v3  ;;  %v806_v7 = vmul.f32 %v717_v4, %v286_v0  ;;  %v807_v8 = vmul.f32 %v717_v4, %v287_v1 }
  0xf6   : > { %v732_v9 = vpop.permute.xlu1 %731 }
  0xf7   : > { %887 = vst [vmem:[%s1283_s22 + $0x240] sm:$0xff] %v806_v7  ;;  %888 = vst.msk [vmem:[%s1283_s22 + $0x248] sm:$0xff] %vm815_vm0, %v807_v8  ;;  %v812_v12 = vmul.f32 %v732_v9, %v292_v5  ;;  %v813_v13 = vmul.f32 %v732_v9, %v293_v6 }
  0xf8   : > { %v727_v14 = vpop.permute.xlu0 %726 }
  0xf9   : > { %893 = vst [vmem:[%s1283_s22 + $0x270] sm:$0xff] %v812_v12  ;;  %894 = vst.msk [vmem:[%s1283_s22 + $0x278] sm:$0xff] %vm815_vm0, %v813_v13  ;;  %v810_v15 = vmul.f32 %v727_v14, %v290_v10  ;;  %v811_v16 = vmul.f32 %v727_v14, %v291_v11 }
  0xfb   : > { %891 = vst [vmem:[%s1283_s22 + $0x260] sm:$0xff] %v810_v15  ;;  %892 = vst.msk [vmem:[%s1283_s22 + $0x268] sm:$0xff] %vm815_vm0, %v811_v16 }
  0xfc PF: > { %s12_s9 = sadd.s32 1, %s1196_s9  }
  0xfd   : > { %p9_p4 = scmp.ge.s32.totalorder %s12_s9, 4  }
  0xff   :  { %11 = sbr.rel (!%p9_p4) target bundleno = 1 (0x1), region = 61 }

</bundles_post_ra>
